<compile_context>
chip_gen: v7x
topology: tpu7x:2x2x1
jax: 0.10.0
libtpu: 0.0.40
codegen_flags: <defaults>
</compile_context>

<pallas_src>
import jax
import jax.numpy as jnp
from jax import lax
from jax.experimental import pallas as pl
from jax.experimental.pallas import tpu as pltpu


def factual_explainer_kernel(x_ref, w1_ref, b1_ref, w2t_ref, b2_ref, out_ref):
    # Layer 1: [Bt, Din] @ [Din, H] -> [Bt, H], f32 accumulation on the MXU.
    x = x_ref[...]
    h = jnp.dot(x, w1_ref[...], preferred_element_type=jnp.float32)
    h = jnp.maximum(h + b1_ref[...].astype(jnp.float32), 0.0)          # bias + ReLU (VPU)
    h = h.astype(w2t_ref.dtype)          # explicit downcast hook for the bf16 path
    # Layer 2 as an NT matmul: [1, H] x [Bt, H]^T -> [1, Bt].  Batch lands on the lane
    # axis, so the store below is lane-dense (no padding, no masked 1-of-128 stores).
    y = lax.dot_general(w2t_ref[...], h, (((1,), (1,)), ((), ())),
                        preferred_element_type=jnp.float32)
    out_ref[...] = (y + b2_ref[...].astype(jnp.float32)).astype(out_ref.dtype)


def _pick_batch_tile(batch, d_in, itemsize, *, lane=128, min_steps=4,
                     vmem_budget_bytes=8 * 1024 * 1024):
    """Batch tile: multiple of 128 (batch is the output lane axis), sized so the grid
    has >= min_steps steps when possible, capped so the double-buffered x tile stays
    well inside every generation's scoped-VMEM default (16 MiB v5e, 32 MiB v6e/v7x)."""
    cap = (vmem_budget_bytes // (2 * d_in * itemsize)) // lane * lane
    cap = max(lane, min(cap, 8192))
    tile = max(lane, (batch // min_steps) // lane * lane)
    return min(tile, cap)


def factual_explainer_forward(x, w1, b1, w2, b2, *, batch_tile=None, compute_dtype=None):
    """x: [B, expl_embedding]; w1: [expl_embedding, 64]; b1: [1, 64];
       w2: [64, 1]; b2: [1, 1].  Returns [B, 1] (same dtype as x)."""
    B, d_in = x.shape
    d_hid = w1.shape[1]
    assert w2.shape == (d_hid, 1) and b1.shape == (1, d_hid) and b2.shape == (1, 1)

    out_dtype = x.dtype
    w2t = w2.T                      # [1, H]: kernel computes x@W1, then W2^T x h^T

    if compute_dtype is not None:   # bf16 bandwidth option (f32 accumulation kept)
        x = x.astype(compute_dtype)
        w1 = w1.astype(compute_dtype)
        w2t = w2t.astype(compute_dtype)

    if batch_tile is None:
        batch_tile = _pick_batch_tile(B, d_in, jnp.dtype(x.dtype).itemsize)
    assert batch_tile % 128 == 0, "batch_tile must be a multiple of 128 (output lanes)"

    # Pad the batch up to a tile multiple; pad rows are sliced away after the call.
    n_steps = -(-B // batch_tile)
    B_pad = n_steps * batch_tile
    x_p = x if B_pad == B else jnp.pad(x, ((0, B_pad - B), (0, 0)))

    itemsize = jnp.dtype(x_p.dtype).itemsize
    cost = pl.CostEstimate(
        flops=2 * B_pad * d_in * d_hid + 2 * B_pad * d_hid,
        transcendentals=0,
        bytes_accessed=(x_p.size * itemsize
                        + w1.size * jnp.dtype(w1.dtype).itemsize
                        + b1.size * jnp.dtype(b1.dtype).itemsize
                        + w2t.size * jnp.dtype(w2t.dtype).itemsize
                        + b2.size * jnp.dtype(b2.dtype).itemsize
                        + B_pad * jnp.dtype(out_dtype).itemsize),
    )

    out_row = pl.pallas_call(
        factual_explainer_kernel,
        out_shape=jax.ShapeDtypeStruct((1, B_pad), out_dtype),
        grid_spec=pltpu.PrefetchScalarGridSpec(
            num_scalar_prefetch=0,
            grid=(n_steps,),
            in_specs=[
                pl.BlockSpec((batch_tile, d_in), lambda i: (i, 0)),   # x tile (streamed)
                pl.BlockSpec((d_in, d_hid), lambda i: (0, 0)),        # W1 (VMEM-resident)
                pl.BlockSpec((1, d_hid), lambda i: (0, 0)),           # b1
                pl.BlockSpec((1, d_hid), lambda i: (0, 0)),           # W2^T (resident)
                pl.BlockSpec((1, 1), lambda i: (0, 0)),               # b2
            ],
            out_specs=pl.BlockSpec((1, batch_tile), lambda i: (0, i)),  # lane-dense row
        ),
        compiler_params=pltpu.CompilerParams(
            dimension_semantics=("parallel",),   # batch steps shard across v7x's 2 TCs
        ),
        cost_estimate=cost,
    )(x_p, w1, b1, w2t, b2)

    # (1, B_pad) -> (B_pad, 1); drop pad rows.
    return out_row.reshape(B_pad, 1)[:B]


if __name__ == "__main__":
    # Small shapes consistent with the module's forward.
    expl_embedding = 64        # constructor arg of FactualExplainer
    hidden = 64                # fixed by nn.Linear(expl_embedding, 64)
    out_dim = 1                # fixed by nn.Linear(64, 1)
    batch = 300                # deliberately not a multiple of 128 -> exercises padding

    key = jax.random.PRNGKey(0)
    k_x, k_w1, k_b1, k_w2, k_b2 = jax.random.split(key, 5)

    # Deterministic synthetic parameters (roughly PyTorch Linear init scale).
    lim1 = 1.0 / jnp.sqrt(float(expl_embedding))
    lim2 = 1.0 / jnp.sqrt(float(hidden))
    x = jax.random.normal(k_x, (batch, expl_embedding), dtype=jnp.float32)
    w1 = jax.random.uniform(k_w1, (expl_embedding, hidden), jnp.float32, -lim1, lim1)
    b1 = jax.random.uniform(k_b1, (1, hidden), jnp.float32, -lim1, lim1)
    w2 = jax.random.uniform(k_w2, (hidden, out_dim), jnp.float32, -lim2, lim2)
    b2 = jax.random.uniform(k_b2, (1, out_dim), jnp.float32, -lim2, lim2)

    out = factual_explainer_forward(x, w1, b1, w2, b2)
    out = jax.block_until_ready(out)

    # Pure-JAX reference (matches the PyTorch forward: Linear -> ReLU -> Linear).
    ref = jnp.maximum(x @ w1 + b1, 0.0) @ w2 + b2
    assert out.shape == (batch, out_dim)
    assert jnp.allclose(out, ref, atol=1e-5, rtol=1e-5)

    print("KERNEL_OK")
</pallas_src>

<mosaic_0001>
module attributes {stable_mosaic.version = 11 : i64} {
  func.func @factual_explainer_kernel(%arg0: i32, %arg1: memref<128x64xf32, #tpu.memory_space<vmem>>, %arg2: memref<64x64xf32, #tpu.memory_space<vmem>>, %arg3: memref<1x64xf32, #tpu.memory_space<vmem>>, %arg4: memref<1x64xf32, #tpu.memory_space<vmem>>, %arg5: memref<1x1xf32, #tpu.memory_space<vmem>>, %arg6: memref<1x128xf32, #tpu.memory_space<vmem>>) attributes {dimension_semantics = [#tpu.dimension_semantics<parallel>], iteration_bounds = array<i64: 3>, scalar_prefetch = 0 : i64, scratch_operands = 0 : i64, tpu.core_type = #tpu.core_type<tc>, window_params = [{transform_indices = @transform_0, window_bounds = array<i64: 128, 64>}, {pipeline_mode = #tpu.pipeline_mode<synchronous>, transform_indices = @transform_1, window_bounds = array<i64: 64, 64>}, {pipeline_mode = #tpu.pipeline_mode<synchronous>, transform_indices = @transform_2, window_bounds = array<i64: 1, 64>}, {pipeline_mode = #tpu.pipeline_mode<synchronous>, transform_indices = @transform_3, window_bounds = array<i64: 1, 64>}, {pipeline_mode = #tpu.pipeline_mode<synchronous>, transform_indices = @transform_4, window_bounds = array<i64: 1, 1>}, {transform_indices = @transform_5, window_bounds = array<i64: 1, 128>}]} {
    %c0 = arith.constant 0 : index
    %c0_0 = arith.constant 0 : index
    %0 = vector.load %arg1[%c0, %c0_0] : memref<128x64xf32, #tpu.memory_space<vmem>>, vector<128x64xf32>
    %c0_1 = arith.constant 0 : index
    %c0_2 = arith.constant 0 : index
    %1 = vector.load %arg2[%c0_1, %c0_2] : memref<64x64xf32, #tpu.memory_space<vmem>>, vector<64x64xf32>
    %cst = arith.constant dense<0.000000e+00> : vector<128x64xf32>
    %2 = tpu.matmul %0, %1, %cst {dimension_numbers = #tpu.dot_dimension_numbers<[1], [0], [0], [1], [0, 0, 1, 1], [], []>} : vector<128x64xf32>, vector<64x64xf32>, vector<128x64xf32> -> vector<128x64xf32>
    %c0_3 = arith.constant 0 : index
    %c0_4 = arith.constant 0 : index
    %3 = vector.load %arg3[%c0_3, %c0_4] : memref<1x64xf32, #tpu.memory_space<vmem>>, vector<1x64xf32>
    %4 = vector.broadcast %3 : vector<1x64xf32> to vector<128x64xf32>
    %5 = arith.addf %2, %4 : vector<128x64xf32>
    %cst_5 = arith.constant 0.000000e+00 : f32
    %6 = vector.broadcast %cst_5 : f32 to vector<128x64xf32>
    %7 = arith.maximumf %5, %6 : vector<128x64xf32>
    %c0_6 = arith.constant 0 : index
    %c0_7 = arith.constant 0 : index
    %8 = vector.load %arg4[%c0_6, %c0_7] : memref<1x64xf32, #tpu.memory_space<vmem>>, vector<1x64xf32>
    %cst_8 = arith.constant dense<0.000000e+00> : vector<1x128xf32>
    %9 = tpu.matmul %8, %7, %cst_8 {dimension_numbers = #tpu.dot_dimension_numbers<[1], [1], [0], [0], [0, 0, 1, 0], [], []>} : vector<1x64xf32>, vector<128x64xf32>, vector<1x128xf32> -> vector<1x128xf32>
    %c0_9 = arith.constant 0 : index
    %c0_10 = arith.constant 0 : index
    %10 = vector.load %arg5[%c0_9, %c0_10] : memref<1x1xf32, #tpu.memory_space<vmem>>, vector<1x1xf32>
    %11 = vector.broadcast %10 : vector<1x1xf32> to vector<1x128xf32>
    %12 = arith.addf %9, %11 : vector<1x128xf32>
    %c0_11 = arith.constant 0 : index
    %c0_12 = arith.constant 0 : index
    %13 = vector.load %arg6[%c0_11, %c0_12] : memref<1x128xf32, #tpu.memory_space<vmem>>, vector<1x128xf32>
    tpu.vector_store %arg6[%c0_11, %c0_12], %12 {strides = array<i32>} : memref<1x128xf32, #tpu.memory_space<vmem>>, vector<1x128xf32>,
    return
  }
  func.func @transform_0(%arg0: i32) -> (i32, i32) {
    %c0_i32 = arith.constant 0 : i32
    %c0_i32_0 = arith.constant 0 : i32
    return %arg0, %c0_i32 : i32, i32
  }
  func.func @transform_1(%arg0: i32) -> (i32, i32) {
    %c0_i32 = arith.constant 0 : i32
    %c0_i32_0 = arith.constant 0 : i32
    %c0_i32_1 = arith.constant 0 : i32
    return %c0_i32, %c0_i32_0 : i32, i32
  }
  func.func @transform_2(%arg0: i32) -> (i32, i32) {
    %c0_i32 = arith.constant 0 : i32
    %c0_i32_0 = arith.constant 0 : i32
    %c0_i32_1 = arith.constant 0 : i32
    return %c0_i32, %c0_i32_0 : i32, i32
  }
  func.func @transform_3(%arg0: i32) -> (i32, i32) {
    %c0_i32 = arith.constant 0 : i32
    %c0_i32_0 = arith.constant 0 : i32
    %c0_i32_1 = arith.constant 0 : i32
    return %c0_i32, %c0_i32_0 : i32, i32
  }
  func.func @transform_4(%arg0: i32) -> (i32, i32) {
    %c0_i32 = arith.constant 0 : i32
    %c0_i32_0 = arith.constant 0 : i32
    %c0_i32_1 = arith.constant 0 : i32
    return %c0_i32, %c0_i32_0 : i32, i32
  }
  func.func @transform_5(%arg0: i32) -> (i32, i32) {
    %c0_i32 = arith.constant 0 : i32
    %c0_i32_0 = arith.constant 0 : i32
    return %c0_i32, %arg0 : i32, i32
  }
}

</mosaic_0001>

<bundles_post_ra>
// kernel: tpu_custom_call.1
= control target key start
LH: loop header
LB: loop body
LE: loop exit
PB: predicated region body
PF: predicated region fallthrough
CT: control target
= control target key end

     0   :  { %s1215_s0 = inlined_call_operand.vmem [shape: f32[384,64], index: 0, kind: input, shape index: {}]   ;;  %s1216_s1 = inlined_call_operand.vmem [shape: f32[64,64], index: 1, kind: input, shape index: {}]   ;;  %s1217_s2 = inlined_call_operand.vmem [shape: f32[1,64], index: 2, kind: input, shape index: {}]   ;;  %s1218_s3 = inlined_call_operand.vmem [shape: f32[1,64], index: 3, kind: input, shape index: {}]   ;;  %s1219_s4 = inlined_call_operand.<no memory space> [shape: f32[1,1], index: 4, kind: input, shape index: {}]   ;;  %s1220_s5 = inlined_call_operand.hbm [shape: f32[1,384], index: 5, kind: output, shape index: {}]  }
   0x1   :  { %v10_v0 = vstv %s1219_s4 }
   0x2   :  { %11 = vst [vmem:[#allocation2] sm:$0x1] %v10_v0 }
   0x3   :  { %12 = vsyncpa [#allocation4], 0 }
   0x4   :  { %14 = vsyncpa [#allocation4 + $0x1], 0  ;;  %s1021_s20 = smov 0   ;;  %s1023_s21 = smov 0  }
   0x5   :  { %s1025_s22 = smov 0   ;;  %s1027_s23 = smov 0  }
   0x6 LB: > { %s667_s4 = sadd.s32 4294967295, %s981_s23   ;;  %s668_s24 = sadd.s32 4294967294, %s981_s23   ;;  %s981_s23 = sphi %s1027_s23, %s1228_s23   ;;  %s977_s22 = sphi %s1025_s22, %s1227_s22   ;;  %s973_s21 = sphi %s1023_s21, %s1226_s21   ;;  %s969_s20 = sphi %s1021_s20, %s1225_s20  }
   0x7   : > { %s1044_s25 = sadd.s32 1, %s981_s23   ;;  %s137_s26 = sadd.s32 1, %s977_s22 }
   0x8   : > { %s134_s27 = ssub.s32 %s981_s23, %s1044_s25  ;;  %p147_p0 = scmp.ne.s32.totalorder %s977_s22, %s973_s21 }
   0x9   : > { %p135_p1 = scmp.eq.s32.totalorder %s134_s27, 0  ;;  %p148_p2 = scmp.eq.s32.totalorder %s667_s4, 2 }
   0xa   : > { %p153_p3 = scmp.ne.s32.totalorder %s973_s21, %s969_s20  ;;  %p154_p4 = scmp.eq.s32.totalorder %s668_s24, 2 }
   0xb   : > { %s1054_s28 = scalar_select %p135_p1, %s977_s22, %s137_s26  }
   0xc   : > { %p1056_p5 = por %p148_p2, %p147_p0  ;;  %p1060_p6 = por %p154_p4, %p153_p3 }
   0xd   : > { %p671_p7 = scmp.ge.s32.totalorder %s981_s23, 1  ;;  %p193_p8 = scmp.lt.s32.totalorder %s981_s23, 4 }
   0xf   : > { %p194_p9 = pnand %p671_p7, %p193_p8 }
  0x10   : > { %v242_v1 = vld [vmem:[%s1216_s1] sm:$0xff] (!%p194_p9)  ;;  %v243_v2 = vld [vmem:[%s1216_s1 + $0x8] sm:$0xff] (!%p194_p9)  ;;  %v244_v3 = vld [vmem:[%s1216_s1 + $0x10] sm:$0xff] (!%p194_p9)  ;;  %s1075_s12 = sshll.u32 (!%p194_p9), %s667_s4, 4  ;;  %vm257_vm0 = vcmask (!%p194_p9), 523264   ;;  %v983_v29 = vmov (!%p194_p9), 0.0|0.0  }
  0x11   : > { %197 = sbr.rel (%p194_p9) target bundleno = 545 (0x221), region = 40  ;;  %v827_v4 = vpack.c.bf16 (!%p194_p9), %v243_v2, %v242_v1  ;;  %v245_v5 = vld [vmem:[%s1216_s1 + $0x18] sm:$0xff] (!%p194_p9)  ;;  %p221_p10 = scmp.lt.s32.totalorder (!%p194_p9), %s1075_s12, 47  ;;  %v246_v7 = vld [vmem:[%s1216_s1 + $0x20] sm:$0xff] (!%p194_p9)  ;;  %v247_v8 = vld [vmem:[%s1216_s1 + $0x28] sm:$0xff] (!%p194_p9)  ;;  %843 = vmatprep.subr.bf16.mxu1 (!%p194_p9), %v983_v29  ;;  %vm984_vm1 = vmmov (!%p194_p9), 0  }
  0x12   : > { %v831_v6 = vpack.c.bf16 (!%p194_p9), %v245_v5, %v244_v3  ;;  %v835_v9 = vpack.c.bf16 (!%p194_p9), %v247_v8, %v246_v7  ;;  %v248_v10 = vld [vmem:[%s1216_s1 + $0x30] sm:$0xff] (!%p194_p9)  ;;  %v249_v11 = vld [vmem:[%s1216_s1 + $0x38] sm:$0xff] (!%p194_p9)  ;;  %v985_v30 = vmov (!%p194_p9), 0.0   ;;  %v468_v31 = vld [vmem:[#allocation2] sm:$0x1] (!%p194_p9)  ;;  %v986_v32 = vmov (!%p194_p9), 0  }
  0x13   : > { %828 = vmatprep.subr.bf16.mxu0 (!%p194_p9), %v827_v4  ;;  %v839_v13 = vpack.c.bf16 (!%p194_p9), %v249_v11, %v248_v10  ;;  %824 = vmatprep.mubr.msk.f32.mxu1 (!%p194_p9), %vm984_vm1, %v985_v30  ;;  %v674_v33 = vld [vmem:[%s1217_s2] ss:$0 sm:$0xff] (!%p194_p9)  ;;  %vm1137_vm2 = vmpackc.low (!%p194_p9), %vm257_vm0, %vm257_vm0  ;;  %s218_s15 = sand.u32 (!%p194_p9), 1, %s973_s21   ;;  %s987_s27 = smov (!%p194_p9), [#allocation3]  }
  0x14   : > { %830 = vmatpush3.bf16.msra.mxu0 (!%p194_p9), %v827_v4  ;;  %918 = vset.pattern.permute.xlu0 (!%p194_p9), %v986_v32  ;;  %s219_s16 = scalar_lea.vmem (!%p194_p9), [#allocation3], %s218_s15  ;;  %s601_s24 = scalar_lea.sflag (!%p194_p9), [#allocation4], %s218_s15 }
  0x15   : > { %832 = vmatprep.subr.bf16.mxu0 (!%p194_p9), %v831_v6  ;;  %471 = vperm.xlu0 (!%p194_p9), %918, %v468_v31   ;;  %s613_s17 = sshll.u32 (!%p194_p9), %s219_s16, 4  ;;  %s923_s6 = sshll.u32 (!%p194_p9), %s987_s27, 4  ;;  %s1175_s17 = int_to_ptr.vmem [resolvable:$true] %s613_s17  ;;  %s924_s6 = int_to_ptr.vmem [resolvable:$false] %s923_s6 }
  0x16   : > { %s919_s26 = scalar_lea.vmem (!%p194_p9), %s1175_s17, 16  ;;  %s925_s7 = scalar_lea.vmem (!%p194_p9), %s924_s6, 32 }
  0x17   : > { %p920_p11 = scmp.ne.s32.totalorder (!%p194_p9), %s1175_s17, %s919_s26  ;;  %p926_p0 = scmp.lt.s32.totalorder (!%p194_p9), %s1175_s17, %s924_s6 }
  0x18   : > { %s222_s19 = scalar_select %p221_p10, %s1075_s12, 47  ;;  %834 = vmatpush3.bf16.msra.mxu0 %v831_v6 }
  0x19   : > { %836 = vmatprep.subr.bf16.mxu0 %v835_v9  ;;  %p921_p12 = pnand %p920_p11, %p1056_p5  ;;  %p927_p1 = scmp.lt.s32.totalorder %s925_s7, %s919_s26 }
  0x1a   : > { %s673_s4 = sshll.u32 %s222_s19, 3 }
  0x1b   : > { %s1097_s9 = scalar_lea.vmem %s1215_s0, %s673_s4  ;;  %s1173_s4 = scalar_lea.hbm %s1220_s5, %s1075_s12 }
  0x1c   : > { %v226_v12 = vld [vmem:[%s1097_s9] sm:$0xff]  ;;  %838 = vmatpush3.bf16.msra.mxu0 %v835_v9  ;;  %v227_v14 = vld [vmem:[%s1097_s9 + $0x8] sm:$0xff]  ;;  %v228_v15 = vld [vmem:[%s1097_s9 + $0x10] sm:$0xff]  ;;  %p922_p13 = pneg %p921_p12  ;;  %p928_p2 = por %p927_p1, %p926_p0 }
  0x1d   : > { %768 = vmatprep.mubr.msk.f32.mxu0 %vm257_vm0, %v226_v12  ;;  %840 = vmatprep.subr.bf16.mxu0 %v839_v13  ;;  %v229_v16 = vld [vmem:[%s1097_s9 + $0x18] sm:$0xff]  ;;  %v230_v17 = vld [vmem:[%s1097_s9 + $0x20] sm:$0xff]  ;;  %v231_v18 = vld [vmem:[%s1097_s9 + $0x28] sm:$0xff] }
  0x1e   : > { %v232_v19 = vld [vmem:[%s1097_s9 + $0x30] sm:$0xff]  ;;  %v233_v20 = vld [vmem:[%s1097_s9 + $0x38] sm:$0xff]  ;;  %v234_v21 = vld [vmem:[%s1097_s9 + $0x40] sm:$0xff]  ;;  %p929_p3 = pnand %p928_p2, %p922_p13 }
  0x1f   : > { %v235_v22 = vld [vmem:[%s1097_s9 + $0x48] sm:$0xff]  ;;  %v236_v23 = vld [vmem:[%s1097_s9 + $0x50] sm:$0xff]  ;;  %v237_v24 = vld [vmem:[%s1097_s9 + $0x58] sm:$0xff] }
  0x20   : > { %842 = vmatpush3.bf16.msra.mxu0 %v839_v13  ;;  %v238_v25 = vld [vmem:[%s1097_s9 + $0x60] sm:$0xff]  ;;  %v239_v26 = vld [vmem:[%s1097_s9 + $0x68] sm:$0xff]  ;;  %v240_v27 = vld [vmem:[%s1097_s9 + $0x70] sm:$0xff] }
  0x21   : > { %v241_v28 = vld [vmem:[%s1097_s9 + $0x78] sm:$0xff] }
  0x23   : > { %769 = vmatmul.mubr.msk.f32.vlgmr.msra.gmra.mrb[0].mxu0 %vm257_vm0, %v227_v14 }
  0x24   : > { %771 = vmatprep.mubr.msk.f32.mxu0 %vm257_vm0, %v228_v15 }
  0x27   : > { %772 = vmatmul.mubr.msk.f32.gmra.mrb[2].mxu0 %vm257_vm0, %v229_v16 }
  0x28   : > { %774 = vmatprep.mubr.msk.f32.mxu0 %vm257_vm0, %v230_v17 }
  0x2b   : > { %775 = vmatmul.mubr.msk.f32.gmra.mrb[4].mxu0 %vm257_vm0, %v231_v18 }
  0x2c   : > { %777 = vmatprep.mubr.msk.f32.mxu0 %vm257_vm0, %v232_v19 }
  0x2f   : > { %778 = vmatmul.mubr.msk.f32.gmra.mrb[6].mxu0 %vm257_vm0, %v233_v20 }
  0x30   : > { %780 = vmatprep.mubr.msk.f32.mxu0 %vm257_vm0, %v234_v21 }
  0x33   : > { %781 = vmatmul.mubr.msk.f32.gmra.mrb[8].mxu0 %vm257_vm0, %v235_v22 }
  0x34   : > { %783 = vmatprep.mubr.msk.f32.mxu0 %vm257_vm0, %v236_v23 }
  0x37   : > { %784 = vmatmul.mubr.msk.f32.gmra.mrb[10].mxu0 %vm257_vm0, %v237_v24 }
  0x38   : > { %786 = vmatprep.mubr.msk.f32.mxu0 %vm257_vm0, %v238_v25 }
  0x3b   : > { %787 = vmatmul.mubr.msk.f32.gmra.mrb[12].mxu0 %vm257_vm0, %v239_v26 }
  0x3c   : > { %789 = vmatprep.mubr.msk.f32.mxu0 %vm257_vm0, %v240_v27  ;;  %v467_v27 = vld [vmem:[%s1218_s3] sm:$0x1] }
  0x3f   : > { %790 = vmatmul.mubr.msk.f32.gmra.mrb[14].mxu0 %vm257_vm0, %v241_v28  ;;  %v474_v28 = vlaneseq }
  0x41   : > { %v475_v30 = vshrl.u32 %v474_v28, 7 }
  0x43   : > { %v476_v31 = vsub.s32 0, %v475_v30 }
  0x94   : > { %v472_v32 = vpop.permute.xlu0 %471 }
  0xf6   : > { %v770_v34 = vpop.f32.mrb[0].mxu0 }
  0xf7   : > { %v378_v35 = vadd.f32 %v770_v34, %v674_v33  ;;  %v372_v36 = vpop.f32.mrb[1].mxu0 }
  0xf8   : > { %v373_v37 = vadd.f32 %v674_v33, %v372_v36 }
  0xf9   : > { %v452_v38 = vmax.f32 %v378_v35, 0.0 }
  0xfa   : > { %v451_v39 = vmax.f32 %v373_v37, 0.0  ;;  %v773_v40 = vpop.f32.mrb[2].mxu0 }
  0xfb   : > { %v388_v41 = vadd.f32 %v773_v40, %v674_v33  ;;  %v382_v42 = vpop.f32.mrb[3].mxu0 }
  0xfc   : > { %v844_v44 = vpack.c.bf16 %v452_v38, %v451_v39  ;;  %v383_v45 = vadd.f32 %v674_v33, %v382_v42 }
  0xfd   : > { %v454_v46 = vmax.f32 %v388_v41, 0.0 }
  0xfe   : > { %v453_v47 = vmax.f32 %v383_v45, 0.0  ;;  %846 = vmatpush3.bf16.xpose.msk.msra.mxu1 %vm1137_vm2, %v844_v44  ;;  %v776_v48 = vpop.f32.mrb[4].mxu0 }
  0xff   : > { %v398_v49 = vadd.f32 %v776_v48, %v674_v33  ;;  %847 = vmatprep.subr.bf16.mxu1 %v983_v29  ;;  %v392_v50 = vpop.f32.mrb[5].mxu0 }
 0x100   : > { %v848_v51 = vpack.c.bf16 %v454_v46, %v453_v47  ;;  %v393_v52 = vadd.f32 %v674_v33, %v392_v50 }
 0x101   : > { %v456_v53 = vmax.f32 %v398_v49, 0.0 }
 0x102   : > { %v455_v54 = vmax.f32 %v393_v52, 0.0  ;;  %v779_v55 = vpop.f32.mrb[6].mxu0 }
 0x103   : > { %v408_v56 = vadd.f32 %v779_v55, %v674_v33  ;;  %v402_v57 = vpop.f32.mrb[7].mxu0 }
 0x104   : > { %v852_v58 = vpack.c.bf16 %v456_v53, %v455_v54  ;;  %v403_v59 = vadd.f32 %v674_v33, %v402_v57 }
 0x105   : > { %v458_v60 = vmax.f32 %v408_v56, 0.0 }
 0x106   : > { %850 = vmatpush3.bf16.xpose.msk.msra.mxu1 %vm1137_vm2, %v848_v51  ;;  %v457_v61 = vmax.f32 %v403_v59, 0.0  ;;  %v782_v62 = vpop.f32.mrb[8].mxu0 }
 0x107   : > { %851 = vmatprep.subr.bf16.mxu1 %v983_v29  ;;  %v418_v63 = vadd.f32 %v782_v62, %v674_v33  ;;  %v412_v0 = vpop.f32.mrb[9].mxu0 }
 0x108   : > { %v856_v1 = vpack.c.bf16 %v458_v60, %v457_v61  ;;  %v413_v2 = vadd.f32 %v674_v33, %v412_v0 }
 0x109   : > { %v460_v3 = vmax.f32 %v418_v63, 0.0 }
 0x10a   : > { %v459_v4 = vmax.f32 %v413_v2, 0.0  ;;  %v785_v5 = vpop.f32.mrb[10].mxu0 }
 0x10b   : > { %v428_v6 = vadd.f32 %v785_v5, %v674_v33  ;;  %v422_v7 = vpop.f32.mrb[11].mxu0 }
 0x10c   : > { %v860_v8 = vpack.c.bf16 %v460_v3, %v459_v4  ;;  %v423_v9 = vadd.f32 %v674_v33, %v422_v7 }
 0x10d   : > { %v462_v10 = vmax.f32 %v428_v6, 0.0 }
 0x10e   : > { %854 = vmatpush3.bf16.xpose.msk.msra.mxu1 %vm1137_vm2, %v852_v58  ;;  %v461_v11 = vmax.f32 %v423_v9, 0.0  ;;  %v788_v12 = vpop.f32.mrb[12].mxu0 }
 0x10f   : > { %855 = vmatprep.subr.bf16.mxu1 %v983_v29  ;;  %v438_v13 = vadd.f32 %v788_v12, %v674_v33  ;;  %v432_v14 = vpop.f32.mrb[13].mxu0 }
 0x110   : > { %v864_v15 = vpack.c.bf16 %v462_v10, %v461_v11  ;;  %v433_v16 = vadd.f32 %v674_v33, %v432_v14 }
 0x111   : > { %v464_v17 = vmax.f32 %v438_v13, 0.0 }
 0x112   : > { %v463_v18 = vmax.f32 %v433_v16, 0.0  ;;  %v791_v19 = vpop.f32.mrb[14].mxu0 }
 0x113   : > { %v448_v20 = vadd.f32 %v791_v19, %v674_v33  ;;  %v442_v21 = vpop.f32.mrb[15].mxu0 }
 0x114   : > { %v868_v22 = vpack.c.bf16 %v464_v17, %v463_v18  ;;  %v443_v23 = vadd.f32 %v674_v33, %v442_v21  ;;  %v477_v33 = vrot.slane %v472_v32, %v476_v31 }
 0x115   : > { %v466_v24 = vmax.f32 %v448_v20, 0.0 }
 0x116   : > { %858 = vmatpush3.bf16.xpose.msk.msra.mxu1 %vm1137_vm2, %v856_v1  ;;  %v465_v25 = vmax.f32 %v443_v23, 0.0 }
 0x117   : > { %859 = vmatprep.subr.bf16.mxu1 %v983_v29 }
 0x118   : > { %v872_v26 = vpack.c.bf16 %v466_v24, %v465_v25 }
 0x11e   : > { %862 = vmatpush3.bf16.xpose.msk.msra.mxu1 %vm1137_vm2, %v860_v8 }
 0x11f   : > { %863 = vmatprep.subr.bf16.mxu1 %v983_v29 }
 0x126   : > { %866 = vmatpush3.bf16.xpose.msk.msra.mxu1 %vm1137_vm2, %v864_v15 }
 0x127   : > { %867 = vmatprep.subr.bf16.mxu1 %v983_v29 }
 0x12e   : > { %870 = vmatpush3.bf16.xpose.msk.msra.mxu1 %vm1137_vm2, %v868_v22 }
 0x12f   : > { %871 = vmatprep.subr.bf16.mxu1 %v983_v29 }
 0x136   : > { %874 = vmatpush3.bf16.xpose.msk.msra.mxu1 %vm1137_vm2, %v872_v26 }
 0x13d   : > { %825 = vmatmul.mubr.msk.f32.vlgmr.msra.gmra.mrb[0].mxu1 %vm257_vm0, %v467_v27 }
 0x210   : > { %v595_v34 = vpop.f32.mrb[0].mxu1 }
 0x211   : > { %v596_v29 = vadd.f32 %v595_v34, %v477_v33  ;;  %v826_v35 = vpop.f32.mrb[1].mxu1 }
 0x213   : > { %599 = vst [vmem:[%s219_s16] sm:$0x1] %v596_v29 }
 0x214   : > { %932 = shalt.err (!%p929_p3)
}
 0x215   : > { %s933_s12 = scalar_lea.hbm %s1173_s4, 16  ;;  %s937_s10 = scalar_lea.hbm %s1220_s5, 48 }
 0x216   : > { %p934_p4 = scmp.ne.s32.totalorder %s1173_s4, %s933_s12  ;;  %p938_p9 = scmp.lt.u32.totalorder %s1173_s4, %s1220_s5 }
 0x217   : > { %p939_p10 = scmp.lt.u32.totalorder %s937_s10, %s933_s12  ;;  %p941_p12 = scmp.lt.u32.totalorder %s933_s12, %s1173_s4 }
 0x218   : > { %p935_p7 = pnand %p934_p4, %p1056_p5 }
 0x219   : > { %p940_p11 = por %p939_p10, %p938_p9 }
 0x21a   : > { %p936_p8 = pneg %p935_p7 }
 0x21b   : > { %p942_p13 = por %p941_p12, %p940_p11 }
 0x21d   : > { %p943_p0 = pnand %p942_p13, %p936_p8 }
 0x21f   : > { %946 = shalt.err (!%p943_p0)
}
 0x220   : > { %875 = dma.vmem_to_hbm [thread:$0]  (%p1056_p5), %s1175_s17, 16, %s1173_s4, %s601_s24  }
 0x221 PF: > { %p881_p1 = scmp.ge.s32.totalorder %s981_s23, 2  ;;  %s625_s14 = sand.u32 1, %s969_s20  }
 0x222   : > { %s626_s15 = scalar_lea.sflag [#allocation4], %s625_s14 }
 0x223   : > { %p878_p2 = pnand %p881_p1, %p1060_p6 }
 0x225   : > { %964 = dma.done.wait (!%p878_p2), %s626_s15, 16  }
 0x226   : > { %966 = vsyncadd (!%p878_p2), %s626_s15, 4294967280  ;;  %p17_p3 = scmp.ge.s32.totalorder %s1044_s25, 5   ;;  %s1225_s20 = smov %s973_s21 }
 0x227   : > { %s1226_s21 = smov %s977_s22  ;;  %s1227_s22 = smov %s1054_s28 }
 0x228   : > { %s1228_s23 = smov %s1044_s25  ;;  %19 = sbr.rel (!%p17_p3) target bundleno = 6 (0x6), region = 75 }
 0x22f   :  { %630 = vsyncpa [#allocation4], 1 }
 0x230   :  { %632 = vsyncpa [#allocation4 + $0x1], 1 }

</bundles_post_ra>
